<compile_context>
chip_gen: v5e
topology: v5e:2x2
jax: 0.10.0
libtpu: 0.0.40
codegen_flags: <defaults>
</compile_context>

<pallas_src>
import math

import jax
import jax.numpy as jnp
from jax import lax
from jax.experimental import pallas as pl
from jax.experimental.pallas import tpu as pltpu


def _round_up(x, m):
    return ((x + m - 1) // m) * m


def _cdiv(a, b):
    return (a + b - 1) // b


def _vmem_capacity_bytes():
    """Per-core VMEM capacity; conservative (v7x, 64 MiB) fallback."""
    try:
        info = pltpu.get_tpu_info()
        cap = getattr(info, "vmem_capacity_bytes", None)
        if cap:
            return int(cap)
    except Exception:
        pass
    return 64 * 1024 * 1024


def _vmem_estimate_bytes(tm, tn, E, x_bytes, w_bytes, out_bytes, h_bytes):
    """Conservative working-set estimate (everything double-buffered)."""
    db = 2
    b = db * tm * E * x_bytes          # features tile
    b += db * E * E * w_bytes          # dense weight (transposed)
    b += db * E * tn * w_bytes         # projection weight tile (transposed)
    b += db * (3 * E + tn) * 4         # biases + LN params (f32)
    b += db * tm * tn * out_bytes      # output tile
    b += tm * E * h_bytes              # h scratch
    return b


def _lm_head_kernel(x_ref, wdt_ref, bd_ref, g_ref, b_ref, wpt_ref, bp_ref,
                    o_ref, h_ref):
    # x_ref:   (TM, E)   input row tile
    # wdt_ref: (E, E)    dense weight, pre-transposed to (in, out)
    # bd_ref:  (1, E)    dense bias (f32)
    # g_ref:   (1, E)    LayerNorm gamma (f32)
    # b_ref:   (1, E)    LayerNorm beta (f32)
    # wpt_ref: (E, TN)   projection weight tile, pre-transposed to (in, out)
    # bp_ref:  (1, TN)   projection bias tile (f32)
    # o_ref:   (TM, TN)  output tile
    # h_ref:   (TM, E)   scratch (compute dtype): cached dense+GELU+LN per row tile

    # dense -> GELU -> LayerNorm once per row tile (j == 0); reused for every
    # vocab tile.  Relies on the vocab axis being "arbitrary" (sequential).
    @pl.when(pl.program_id(1) == 0)
    def _():
        wdt = wdt_ref[...]
        # NOTE: input activations are cast to the weight dtype (bf16 by
        # default) to keep the MXU in native bf16; accumulation stays f32.
        h = jnp.dot(x_ref[...].astype(wdt.dtype), wdt,
                    preferred_element_type=jnp.float32)
        h = h + bd_ref[...]
        # exact erf-based GELU (torch.nn.functional.gelu default), f32 math
        h = 0.5 * h * (1.0 + lax.erf(h * (1.0 / math.sqrt(2.0))))
        # LayerNorm over the hidden axis (eps = 1e-5), elementwise affine
        mean = jnp.mean(h, axis=-1, keepdims=True)
        c = h - mean
        var = jnp.mean(c * c, axis=-1, keepdims=True)
        h = c * lax.rsqrt(var + 1e-5)
        h = h * g_ref[...] + b_ref[...]
        h_ref[...] = h.astype(h_ref.dtype)

    # projection for this vocab tile: plain (TM,E) @ (E,TN) MXU contraction.
    out = jnp.dot(h_ref[...], wpt_ref[...], preferred_element_type=jnp.float32)
    out = out + bp_ref[...]
    o_ref[...] = out.astype(o_ref.dtype)


def roberta_lm_head(features, w_dense, b_dense, ln_gamma, ln_beta,
                    w_proj, b_proj, *, tm=512, tn=2048,
                    param_dtype=jnp.bfloat16, out_dtype=None):
    """features: [N, E].
    w_dense: [E, E] (PyTorch (out, in) layout), b_dense: [E]
    ln_gamma / ln_beta: [E]
    w_proj: [V, E] (PyTorch (out, in) layout), b_proj: [V]
    returns: [N, V] in out_dtype (default: features.dtype)
    """
    N, E = features.shape
    V = w_proj.shape[0]
    out_dtype = out_dtype if out_dtype is not None else features.dtype

    # Weight prep: cast to the streaming dtype and transpose ONCE in the
    # wrapper (amortized / done at weight-prep time) so the kernel's inner
    # vocab loop is a standard contraction with no per-tile layout shuffles.
    compute_dtype = (jnp.dtype(param_dtype) if param_dtype is not None
                     else jnp.dtype(w_dense.dtype))
    wdt = jnp.asarray(w_dense, compute_dtype).T      # (E, E) = (in, out)
    wpt = jnp.asarray(w_proj, compute_dtype).T       # (E, V) = (in, out)

    # Biases / LN params are tiny; keep f32, 2-D (row-broadcastable).
    bd2 = jnp.asarray(b_dense, jnp.float32).reshape(1, E)
    g2 = jnp.asarray(ln_gamma, jnp.float32).reshape(1, E)
    b2 = jnp.asarray(ln_beta, jnp.float32).reshape(1, E)
    bp2 = jnp.asarray(b_proj, jnp.float32).reshape(1, V)

    # ---- row tiling (tm multiple of 8) ----
    tm_eff = min(tm, _round_up(N, 8))
    tm_eff = max(8, _round_up(tm_eff, 8))
    # megacore: try to have >= 2 row tiles so both TensorCores get work.
    if N > 8:
        tm_eff = min(tm_eff, max(8, _round_up(_cdiv(N, 2), 8)))

    # ---- vocab tiling ----
    if V <= tn:
        tn_eff = V                                  # single full-width block
    else:
        tn_eff = _round_up(min(tn, V), 128)

    # ---- generation-aware VMEM clamp (v7x: 64 MiB, v5e/v6e: 128 MiB) ----
    cap = _vmem_capacity_bytes()
    budget = int(cap * 0.75)
    x_bytes = jnp.dtype(features.dtype).itemsize
    w_bytes = compute_dtype.itemsize
    o_bytes = jnp.dtype(out_dtype).itemsize
    h_bytes = compute_dtype.itemsize

    def est(tm_, tn_):
        return _vmem_estimate_bytes(tm_, tn_, E, x_bytes, w_bytes, o_bytes, h_bytes)

    while est(tm_eff, tn_eff) > budget:
        if tn_eff > 512 and tn_eff % 128 == 0:
            tn_eff = max(128, _round_up(tn_eff // 2, 128))
        elif tm_eff > 64:
            tm_eff = max(8, _round_up(tm_eff // 2, 8))
        elif tn_eff > 128 and tn_eff % 128 == 0:
            tn_eff = max(128, _round_up(tn_eff // 2, 128))
        else:
            break

    # ---- padding (only when shapes are ragged w.r.t. the tiles) ----
    N_p = _round_up(N, tm_eff)
    x = features
    if N_p != N:
        x = jnp.pad(x, ((0, N_p - N), (0, 0)))

    V_p = _round_up(V, tn_eff)
    if V_p != V:
        wpt = jnp.pad(wpt, ((0, 0), (0, V_p - V)))
        bp2 = jnp.pad(bp2, ((0, 0), (0, V_p - V)))

    grid = (N_p // tm_eff, V_p // tn_eff)

    vmem_limit = int(min(cap, max(32 * 1024 * 1024,
                                  int(1.5 * est(tm_eff, tn_eff)))))

    def make_call(single_buffer_constants):
        def const_spec(shape):
            # grid-constant operands: the second pipeline buffer is pure VMEM
            # waste, so request single-buffering when supported.
            if single_buffer_constants:
                return pl.BlockSpec(shape, lambda i, j: (0, 0),
                                    pipeline_mode=pl.Buffered(1))
            return pl.BlockSpec(shape, lambda i, j: (0, 0))

        return pl.pallas_call(
            _lm_head_kernel,
            out_shape=jax.ShapeDtypeStruct((N_p, V_p), out_dtype),
            grid_spec=pltpu.PrefetchScalarGridSpec(
                num_scalar_prefetch=0,
                grid=grid,
                in_specs=[
                    pl.BlockSpec((tm_eff, E), lambda i, j: (i, 0)),   # features
                    const_spec((E, E)),                               # dense W^T
                    const_spec((1, E)),                               # dense bias
                    const_spec((1, E)),                               # LN gamma
                    const_spec((1, E)),                               # LN beta
                    pl.BlockSpec((E, tn_eff), lambda i, j: (0, j)),   # proj W^T tile
                    pl.BlockSpec((1, tn_eff), lambda i, j: (0, j)),   # proj bias
                ],
                out_specs=pl.BlockSpec((tm_eff, tn_eff), lambda i, j: (i, j)),
                scratch_shapes=[pltpu.VMEM((tm_eff, E), compute_dtype)],
            ),
            compiler_params=pltpu.CompilerParams(
                dimension_semantics=("parallel", "arbitrary"),
                vmem_limit_bytes=vmem_limit,
            ),
        )

    args = (x, wdt, bd2, g2, b2, wpt, bp2)
    try:
        out_padded = make_call(True)(*args)
    except Exception:
        # pipeline_mode=pl.Buffered(1) unsupported in this JAX/config;
        # fall back to default double-buffering (identical semantics).
        out_padded = make_call(False)(*args)

    if N_p != N or V_p != V:
        out_padded = out_padded[:N, :V]
    return out_padded


def _reference(features, w_dense, b_dense, ln_gamma, ln_beta, w_proj, b_proj):
    x = features @ w_dense.T + b_dense
    x = 0.5 * x * (1.0 + lax.erf(x / jnp.sqrt(2.0)))
    mean = jnp.mean(x, axis=-1, keepdims=True)
    var = jnp.mean((x - mean) ** 2, axis=-1, keepdims=True)
    x = (x - mean) * lax.rsqrt(var + 1e-5) * ln_gamma + ln_beta
    return x @ w_proj.T + b_proj


if __name__ == "__main__":
    # Small shapes: batch=2, seq=8, embed_dim=32, output_dim=64.
    B, T, E, V = 2, 8, 32, 64
    N = B * T

    key = jax.random.PRNGKey(0)
    k = jax.random.split(key, 4)
    features = jax.random.normal(k[0], (B, T, E), jnp.float32)

    # Deterministic synthetic parameters (not a checkpoint load).
    w_dense = jax.random.normal(k[1], (E, E), jnp.float32) * (1.0 / math.sqrt(E))
    b_dense = jax.random.normal(k[2], (E,), jnp.float32) * 0.01
    ln_gamma = jnp.ones((E,), jnp.float32)
    ln_beta = jnp.zeros((E,), jnp.float32)
    w_proj = jax.random.normal(k[3], (V, E), jnp.float32) * (1.0 / math.sqrt(E))
    b_proj = jnp.zeros((V,), jnp.float32)  # module initializes bias to zeros

    feats2d = features.reshape(N, E)
    ref = _reference(feats2d, w_dense, b_dense, ln_gamma, ln_beta, w_proj, b_proj)

    # 1) exact-precision path (f32 weight streams) — tight check.
    out_f32 = roberta_lm_head(feats2d, w_dense, b_dense, ln_gamma, ln_beta,
                              w_proj, b_proj, param_dtype=None)
    out_f32 = jax.block_until_ready(out_f32)
    assert out_f32.shape == (N, V)
    assert jnp.allclose(out_f32, ref, atol=1e-4, rtol=1e-4), "f32 mismatch vs reference"

    # 2) default perf path (bf16 weight streams, f32 accumulation) — loose check.
    out_def = roberta_lm_head(feats2d, w_dense, b_dense, ln_gamma, ln_beta,
                              w_proj, b_proj)
    out_def = jax.block_until_ready(out_def)
    assert out_def.shape == (N, V)
    assert jnp.allclose(out_def.astype(jnp.float32), ref, atol=5e-2, rtol=5e-2), \
        "bf16 mismatch vs reference"

    logits = out_def.reshape(B, T, V)
    jax.block_until_ready(logits)
    print("KERNEL_OK")
</pallas_src>

<mosaic_0001>
module attributes {stable_mosaic.version = 11 : i64} {
  func.func @_lm_head_kernel(%arg0: i32, %arg1: i32, %arg2: memref<8x32xf32, #tpu.memory_space<vmem>>, %arg3: memref<32x32xf32, #tpu.memory_space<vmem>>, %arg4: memref<1x32xf32, #tpu.memory_space<vmem>>, %arg5: memref<1x32xf32, #tpu.memory_space<vmem>>, %arg6: memref<1x32xf32, #tpu.memory_space<vmem>>, %arg7: memref<32x64xf32, #tpu.memory_space<vmem>>, %arg8: memref<1x64xf32, #tpu.memory_space<vmem>>, %arg9: memref<8x64xf32, #tpu.memory_space<vmem>>, %arg10: memref<8x32xf32, #tpu.memory_space<vmem>>) attributes {dimension_semantics = [#tpu.dimension_semantics<parallel>, #tpu.dimension_semantics<arbitrary>], iteration_bounds = array<i64: 2, 1>, scalar_prefetch = 0 : i64, scratch_operands = 1 : i64, tpu.core_type = #tpu.core_type<tc>, window_params = [{transform_indices = @transform_0, window_bounds = array<i64: 8, 32>}, {pipeline_mode = #tpu.pipeline_mode<synchronous>, transform_indices = @transform_1, window_bounds = array<i64: 32, 32>}, {pipeline_mode = #tpu.pipeline_mode<synchronous>, transform_indices = @transform_2, window_bounds = array<i64: 1, 32>}, {pipeline_mode = #tpu.pipeline_mode<synchronous>, transform_indices = @transform_3, window_bounds = array<i64: 1, 32>}, {pipeline_mode = #tpu.pipeline_mode<synchronous>, transform_indices = @transform_4, window_bounds = array<i64: 1, 32>}, {transform_indices = @transform_5, window_bounds = array<i64: 32, 64>}, {transform_indices = @transform_6, window_bounds = array<i64: 1, 64>}, {transform_indices = @transform_7, window_bounds = array<i64: 8, 64>}]} {
    %c0_i32 = arith.constant 0 : i32
    %0 = arith.cmpi eq, %arg1, %c0_i32 : i32
    %1 = arith.extui %0 : i1 to i32
    %c0_i32_0 = arith.constant 0 : i32
    %2 = arith.cmpi ne, %1, %c0_i32_0 : i32
    scf.if %2 {
      %c0_8 = arith.constant 0 : index
      %c0_9 = arith.constant 0 : index
      %10 = vector.load %arg3[%c0_8, %c0_9] : memref<32x32xf32, #tpu.memory_space<vmem>>, vector<32x32xf32>
      %c0_10 = arith.constant 0 : index
      %c0_11 = arith.constant 0 : index
      %11 = vector.load %arg2[%c0_10, %c0_11] : memref<8x32xf32, #tpu.memory_space<vmem>>, vector<8x32xf32>
      %cst_12 = arith.constant dense<0.000000e+00> : vector<8x32xf32>
      %12 = tpu.matmul %11, %10, %cst_12 {dimension_numbers = #tpu.dot_dimension_numbers<[1], [0], [0], [1], [0, 0, 1, 1], [], []>} : vector<8x32xf32>, vector<32x32xf32>, vector<8x32xf32> -> vector<8x32xf32>
      %c0_13 = arith.constant 0 : index
      %c0_14 = arith.constant 0 : index
      %13 = vector.load %arg4[%c0_13, %c0_14] : memref<1x32xf32, #tpu.memory_space<vmem>>, vector<1x32xf32>
      %14 = vector.broadcast %13 : vector<1x32xf32> to vector<8x32xf32>
      %15 = arith.addf %12, %14 : vector<8x32xf32>
      %cst_15 = arith.constant 5.000000e-01 : f32
      %16 = vector.broadcast %cst_15 : f32 to vector<8x32xf32>
      %17 = arith.mulf %16, %15 : vector<8x32xf32>
      %cst_16 = arith.constant 0.707106769 : f32
      %18 = vector.broadcast %cst_16 : f32 to vector<8x32xf32>
      %19 = arith.mulf %15, %18 : vector<8x32xf32>
      %20 = math.erf %19 : vector<8x32xf32>
      %cst_17 = arith.constant 1.000000e+00 : f32
      %21 = vector.broadcast %cst_17 : f32 to vector<8x32xf32>
      %22 = arith.addf %21, %20 : vector<8x32xf32>
      %23 = arith.mulf %17, %22 : vector<8x32xf32>
      %cst_18 = arith.constant dense<0.000000e+00> : vector<8xf32>
      %24 = vector.multi_reduction <add>, %23, %cst_18 [1] : vector<8x32xf32> to vector<8xf32>
      %25 = vector.shape_cast %24 : vector<8xf32> to vector<8x1xf32>
      %cst_19 = arith.constant 3.200000e+01 : f32
      %26 = vector.broadcast %cst_19 : f32 to vector<8x1xf32>
      %27 = arith.divf %25, %26 : vector<8x1xf32>
      %28 = vector.broadcast %27 : vector<8x1xf32> to vector<8x32xf32>
      %29 = arith.subf %23, %28 : vector<8x32xf32>
      %30 = arith.mulf %29, %29 : vector<8x32xf32>
      %cst_20 = arith.constant dense<0.000000e+00> : vector<8xf32>
      %31 = vector.multi_reduction <add>, %30, %cst_20 [1] : vector<8x32xf32> to vector<8xf32>
      %32 = vector.shape_cast %31 : vector<8xf32> to vector<8x1xf32>
      %cst_21 = arith.constant 3.200000e+01 : f32
      %33 = vector.broadcast %cst_21 : f32 to vector<8x1xf32>
      %34 = arith.divf %32, %33 : vector<8x1xf32>
      %cst_22 = arith.constant 9.99999974E-6 : f32
      %35 = vector.broadcast %cst_22 : f32 to vector<8x1xf32>
      %36 = arith.addf %34, %35 : vector<8x1xf32>
      %37 = math.rsqrt %36 : vector<8x1xf32>
      %38 = vector.broadcast %37 : vector<8x1xf32> to vector<8x32xf32>
      %39 = arith.mulf %29, %38 : vector<8x32xf32>
      %c0_23 = arith.constant 0 : index
      %c0_24 = arith.constant 0 : index
      %40 = vector.load %arg5[%c0_23, %c0_24] : memref<1x32xf32, #tpu.memory_space<vmem>>, vector<1x32xf32>
      %41 = vector.broadcast %40 : vector<1x32xf32> to vector<8x32xf32>
      %42 = arith.mulf %39, %41 : vector<8x32xf32>
      %c0_25 = arith.constant 0 : index
      %c0_26 = arith.constant 0 : index
      %43 = vector.load %arg6[%c0_25, %c0_26] : memref<1x32xf32, #tpu.memory_space<vmem>>, vector<1x32xf32>
      %44 = vector.broadcast %43 : vector<1x32xf32> to vector<8x32xf32>
      %45 = arith.addf %42, %44 : vector<8x32xf32>
      %c0_27 = arith.constant 0 : index
      %c0_28 = arith.constant 0 : index
      %46 = vector.load %arg10[%c0_27, %c0_28] : memref<8x32xf32, #tpu.memory_space<vmem>>, vector<8x32xf32>
      tpu.vector_store %arg10[%c0_27, %c0_28], %45 {strides = array<i32>} : memref<8x32xf32, #tpu.memory_space<vmem>>, vector<8x32xf32>,
    } else {
    }
    %c0 = arith.constant 0 : index
    %c0_1 = arith.constant 0 : index
    %3 = vector.load %arg10[%c0, %c0_1] : memref<8x32xf32, #tpu.memory_space<vmem>>, vector<8x32xf32>
    %c0_2 = arith.constant 0 : index
    %c0_3 = arith.constant 0 : index
    %4 = vector.load %arg7[%c0_2, %c0_3] : memref<32x64xf32, #tpu.memory_space<vmem>>, vector<32x64xf32>
    %cst = arith.constant dense<0.000000e+00> : vector<8x64xf32>
    %5 = tpu.matmul %3, %4, %cst {dimension_numbers = #tpu.dot_dimension_numbers<[1], [0], [0], [1], [0, 0, 1, 1], [], []>} : vector<8x32xf32>, vector<32x64xf32>, vector<8x64xf32> -> vector<8x64xf32>
    %c0_4 = arith.constant 0 : index
    %c0_5 = arith.constant 0 : index
    %6 = vector.load %arg8[%c0_4, %c0_5] : memref<1x64xf32, #tpu.memory_space<vmem>>, vector<1x64xf32>
    %7 = vector.broadcast %6 : vector<1x64xf32> to vector<8x64xf32>
    %8 = arith.addf %5, %7 : vector<8x64xf32>
    %c0_6 = arith.constant 0 : index
    %c0_7 = arith.constant 0 : index
    %9 = vector.load %arg9[%c0_6, %c0_7] : memref<8x64xf32, #tpu.memory_space<vmem>>, vector<8x64xf32>
    tpu.vector_store %arg9[%c0_6, %c0_7], %8 {strides = array<i32>} : memref<8x64xf32, #tpu.memory_space<vmem>>, vector<8x64xf32>,
    return
  }
  func.func @transform_0(%arg0: i32, %arg1: i32) -> (i32, i32) {
    %c0_i32 = arith.constant 0 : i32
    %c0_i32_0 = arith.constant 0 : i32
    return %arg0, %c0_i32 : i32, i32
  }
  func.func @transform_1(%arg0: i32, %arg1: i32) -> (i32, i32) {
    %c0_i32 = arith.constant 0 : i32
    %c0_i32_0 = arith.constant 0 : i32
    %c0_i32_1 = arith.constant 0 : i32
    return %c0_i32, %c0_i32_0 : i32, i32
  }
  func.func @transform_2(%arg0: i32, %arg1: i32) -> (i32, i32) {
    %c0_i32 = arith.constant 0 : i32
    %c0_i32_0 = arith.constant 0 : i32
    %c0_i32_1 = arith.constant 0 : i32
    return %c0_i32, %c0_i32_0 : i32, i32
  }
  func.func @transform_3(%arg0: i32, %arg1: i32) -> (i32, i32) {
    %c0_i32 = arith.constant 0 : i32
    %c0_i32_0 = arith.constant 0 : i32
    %c0_i32_1 = arith.constant 0 : i32
    return %c0_i32, %c0_i32_0 : i32, i32
  }
  func.func @transform_4(%arg0: i32, %arg1: i32) -> (i32, i32) {
    %c0_i32 = arith.constant 0 : i32
    %c0_i32_0 = arith.constant 0 : i32
    %c0_i32_1 = arith.constant 0 : i32
    return %c0_i32, %c0_i32_0 : i32, i32
  }
  func.func @transform_5(%arg0: i32, %arg1: i32) -> (i32, i32) {
    %c0_i32 = arith.constant 0 : i32
    %c0_i32_0 = arith.constant 0 : i32
    return %c0_i32, %arg1 : i32, i32
  }
  func.func @transform_6(%arg0: i32, %arg1: i32) -> (i32, i32) {
    %c0_i32 = arith.constant 0 : i32
    %c0_i32_0 = arith.constant 0 : i32
    return %c0_i32, %arg1 : i32, i32
  }
  func.func @transform_7(%arg0: i32, %arg1: i32) -> (i32, i32) {
    %c0_i32 = arith.constant 0 : i32
    return %arg0, %arg1 : i32, i32
  }
}

module attributes {stable_mosaic.version = 11 : i64} {
  func.func @_lm_head_kernel(%arg0: i32, %arg1: i32, %arg2: memref<8x32xf32, #tpu.memory_space<vmem>>, %arg3: memref<32x32xf32, #tpu.memory_space<vmem>>, %arg4: memref<1x32xf32, #tpu.memory_space<vmem>>, %arg5: memref<1x32xf32, #tpu.memory_space<vmem>>, %arg6: memref<1x32xf32, #tpu.memory_space<vmem>>, %arg7: memref<32x64xf32, #tpu.memory_space<vmem>>, %arg8: memref<1x64xf32, #tpu.memory_space<vmem>>, %arg9: memref<8x64xf32, #tpu.memory_space<vmem>>, %arg10: memref<8x32xf32, #tpu.memory_space<vmem>>) attributes {dimension_semantics = [#tpu.dimension_semantics<parallel>, #tpu.dimension_semantics<arbitrary>], iteration_bounds = array<i64: 2, 1>, scalar_prefetch = 0 : i64, scratch_operands = 1 : i64, tpu.core_type = #tpu.core_type<tc>, window_params = [{transform_indices = @transform_0, window_bounds = array<i64: 8, 32>}, {pipeline_mode = #tpu.pipeline_mode<synchronous>, transform_indices = @transform_1, window_bounds = array<i64: 32, 32>}, {pipeline_mode = #tpu.pipeline_mode<synchronous>, transform_indices = @transform_2, window_bounds = array<i64: 1, 32>}, {pipeline_mode = #tpu.pipeline_mode<synchronous>, transform_indices = @transform_3, window_bounds = array<i64: 1, 32>}, {pipeline_mode = #tpu.pipeline_mode<synchronous>, transform_indices = @transform_4, window_bounds = array<i64: 1, 32>}, {transform_indices = @transform_5, window_bounds = array<i64: 32, 64>}, {transform_indices = @transform_6, window_bounds = array<i64: 1, 64>}, {transform_indices = @transform_7, window_bounds = array<i64: 8, 64>}]} {
    %c0_i32 = arith.constant 0 : i32
    %0 = arith.cmpi eq, %arg1, %c0_i32 : i32
    %1 = arith.extui %0 : i1 to i32
    %c0_i32_0 = arith.constant 0 : i32
    %2 = arith.cmpi ne, %1, %c0_i32_0 : i32
    scf.if %2 {
      %c0_8 = arith.constant 0 : index
      %c0_9 = arith.constant 0 : index
      %10 = vector.load %arg3[%c0_8, %c0_9] : memref<32x32xf32, #tpu.memory_space<vmem>>, vector<32x32xf32>
      %c0_10 = arith.constant 0 : index
      %c0_11 = arith.constant 0 : index
      %11 = vector.load %arg2[%c0_10, %c0_11] : memref<8x32xf32, #tpu.memory_space<vmem>>, vector<8x32xf32>
      %cst_12 = arith.constant dense<0.000000e+00> : vector<8x32xf32>
      %12 = tpu.matmul %11, %10, %cst_12 {dimension_numbers = #tpu.dot_dimension_numbers<[1], [0], [0], [1], [0, 0, 1, 1], [], []>} : vector<8x32xf32>, vector<32x32xf32>, vector<8x32xf32> -> vector<8x32xf32>
      %c0_13 = arith.constant 0 : index
      %c0_14 = arith.constant 0 : index
      %13 = vector.load %arg4[%c0_13, %c0_14] : memref<1x32xf32, #tpu.memory_space<vmem>>, vector<1x32xf32>
      %14 = vector.broadcast %13 : vector<1x32xf32> to vector<8x32xf32>
      %15 = arith.addf %12, %14 : vector<8x32xf32>
      %cst_15 = arith.constant 5.000000e-01 : f32
      %16 = vector.broadcast %cst_15 : f32 to vector<8x32xf32>
      %17 = arith.mulf %16, %15 : vector<8x32xf32>
      %cst_16 = arith.constant 0.707106769 : f32
      %18 = vector.broadcast %cst_16 : f32 to vector<8x32xf32>
      %19 = arith.mulf %15, %18 : vector<8x32xf32>
      %20 = math.erf %19 : vector<8x32xf32>
      %cst_17 = arith.constant 1.000000e+00 : f32
      %21 = vector.broadcast %cst_17 : f32 to vector<8x32xf32>
      %22 = arith.addf %21, %20 : vector<8x32xf32>
      %23 = arith.mulf %17, %22 : vector<8x32xf32>
      %cst_18 = arith.constant dense<0.000000e+00> : vector<8xf32>
      %24 = vector.multi_reduction <add>, %23, %cst_18 [1] : vector<8x32xf32> to vector<8xf32>
      %25 = vector.shape_cast %24 : vector<8xf32> to vector<8x1xf32>
      %cst_19 = arith.constant 3.200000e+01 : f32
      %26 = vector.broadcast %cst_19 : f32 to vector<8x1xf32>
      %27 = arith.divf %25, %26 : vector<8x1xf32>
      %28 = vector.broadcast %27 : vector<8x1xf32> to vector<8x32xf32>
      %29 = arith.subf %23, %28 : vector<8x32xf32>
      %30 = arith.mulf %29, %29 : vector<8x32xf32>
      %cst_20 = arith.constant dense<0.000000e+00> : vector<8xf32>
      %31 = vector.multi_reduction <add>, %30, %cst_20 [1] : vector<8x32xf32> to vector<8xf32>
      %32 = vector.shape_cast %31 : vector<8xf32> to vector<8x1xf32>
      %cst_21 = arith.constant 3.200000e+01 : f32
      %33 = vector.broadcast %cst_21 : f32 to vector<8x1xf32>
      %34 = arith.divf %32, %33 : vector<8x1xf32>
      %cst_22 = arith.constant 9.99999974E-6 : f32
      %35 = vector.broadcast %cst_22 : f32 to vector<8x1xf32>
      %36 = arith.addf %34, %35 : vector<8x1xf32>
      %37 = math.rsqrt %36 : vector<8x1xf32>
      %38 = vector.broadcast %37 : vector<8x1xf32> to vector<8x32xf32>
      %39 = arith.mulf %29, %38 : vector<8x32xf32>
      %c0_23 = arith.constant 0 : index
      %c0_24 = arith.constant 0 : index
      %40 = vector.load %arg5[%c0_23, %c0_24] : memref<1x32xf32, #tpu.memory_space<vmem>>, vector<1x32xf32>
      %41 = vector.broadcast %40 : vector<1x32xf32> to vector<8x32xf32>
      %42 = arith.mulf %39, %41 : vector<8x32xf32>
      %c0_25 = arith.constant 0 : index
      %c0_26 = arith.constant 0 : index
      %43 = vector.load %arg6[%c0_25, %c0_26] : memref<1x32xf32, #tpu.memory_space<vmem>>, vector<1x32xf32>
      %44 = vector.broadcast %43 : vector<1x32xf32> to vector<8x32xf32>
      %45 = arith.addf %42, %44 : vector<8x32xf32>
      %c0_27 = arith.constant 0 : index
      %c0_28 = arith.constant 0 : index
      %46 = vector.load %arg10[%c0_27, %c0_28] : memref<8x32xf32, #tpu.memory_space<vmem>>, vector<8x32xf32>
      tpu.vector_store %arg10[%c0_27, %c0_28], %45 {strides = array<i32>} : memref<8x32xf32, #tpu.memory_space<vmem>>, vector<8x32xf32>,
    } else {
    }
    %c0 = arith.constant 0 : index
    %c0_1 = arith.constant 0 : index
    %3 = vector.load %arg10[%c0, %c0_1] : memref<8x32xf32, #tpu.memory_space<vmem>>, vector<8x32xf32>
    %c0_2 = arith.constant 0 : index
    %c0_3 = arith.constant 0 : index
    %4 = vector.load %arg7[%c0_2, %c0_3] : memref<32x64xf32, #tpu.memory_space<vmem>>, vector<32x64xf32>
    %cst = arith.constant dense<0.000000e+00> : vector<8x64xf32>
    %5 = tpu.matmul %3, %4, %cst {dimension_numbers = #tpu.dot_dimension_numbers<[1], [0], [0], [1], [0, 0, 1, 1], [], []>} : vector<8x32xf32>, vector<32x64xf32>, vector<8x64xf32> -> vector<8x64xf32>
    %c0_4 = arith.constant 0 : index
    %c0_5 = arith.constant 0 : index
    %6 = vector.load %arg8[%c0_4, %c0_5] : memref<1x64xf32, #tpu.memory_space<vmem>>, vector<1x64xf32>
    %7 = vector.broadcast %6 : vector<1x64xf32> to vector<8x64xf32>
    %8 = arith.addf %5, %7 : vector<8x64xf32>
    %c0_6 = arith.constant 0 : index
    %c0_7 = arith.constant 0 : index
    %9 = vector.load %arg9[%c0_6, %c0_7] : memref<8x64xf32, #tpu.memory_space<vmem>>, vector<8x64xf32>
    tpu.vector_store %arg9[%c0_6, %c0_7], %8 {strides = array<i32>} : memref<8x64xf32, #tpu.memory_space<vmem>>, vector<8x64xf32>,
    return
  }
  func.func @transform_0(%arg0: i32, %arg1: i32) -> (i32, i32) {
    %c0_i32 = arith.constant 0 : i32
    %c0_i32_0 = arith.constant 0 : i32
    return %arg0, %c0_i32 : i32, i32
  }
  func.func @transform_1(%arg0: i32, %arg1: i32) -> (i32, i32) {
    %c0_i32 = arith.constant 0 : i32
    %c0_i32_0 = arith.constant 0 : i32
    %c0_i32_1 = arith.constant 0 : i32
    return %c0_i32, %c0_i32_0 : i32, i32
  }
  func.func @transform_2(%arg0: i32, %arg1: i32) -> (i32, i32) {
    %c0_i32 = arith.constant 0 : i32
    %c0_i32_0 = arith.constant 0 : i32
    %c0_i32_1 = arith.constant 0 : i32
    return %c0_i32, %c0_i32_0 : i32, i32
  }
  func.func @transform_3(%arg0: i32, %arg1: i32) -> (i32, i32) {
    %c0_i32 = arith.constant 0 : i32
    %c0_i32_0 = arith.constant 0 : i32
    %c0_i32_1 = arith.constant 0 : i32
    return %c0_i32, %c0_i32_0 : i32, i32
  }
  func.func @transform_4(%arg0: i32, %arg1: i32) -> (i32, i32) {
    %c0_i32 = arith.constant 0 : i32
    %c0_i32_0 = arith.constant 0 : i32
    %c0_i32_1 = arith.constant 0 : i32
    return %c0_i32, %c0_i32_0 : i32, i32
  }
  func.func @transform_5(%arg0: i32, %arg1: i32) -> (i32, i32) {
    %c0_i32 = arith.constant 0 : i32
    %c0_i32_0 = arith.constant 0 : i32
    return %c0_i32, %arg1 : i32, i32
  }
  func.func @transform_6(%arg0: i32, %arg1: i32) -> (i32, i32) {
    %c0_i32 = arith.constant 0 : i32
    %c0_i32_0 = arith.constant 0 : i32
    return %c0_i32, %arg1 : i32, i32
  }
  func.func @transform_7(%arg0: i32, %arg1: i32) -> (i32, i32) {
    %c0_i32 = arith.constant 0 : i32
    return %arg0, %arg1 : i32, i32
  }
}

</mosaic_0001>

<bundles_post_ra>
// kernel: tpu_custom_call.1
= control target key start
LH: loop header
LB: loop body
LE: loop exit
PB: predicated region body
PF: predicated region fallthrough
CT: control target
= control target key end

     0   :  { %s1154_s0 = inlined_call_operand.hbm [shape: f32[16,32], index: 0, kind: input, shape index: {}]   ;;  %s1155_s1 = inlined_call_operand.hbm [shape: f32[32,32], index: 1, kind: input, shape index: {}]   ;;  %s1156_s2 = inlined_call_operand.vmem [shape: f32[1,32], index: 2, kind: input, shape index: {}]   ;;  %s1157_s3 = inlined_call_operand.vmem [shape: f32[1,32], index: 3, kind: input, shape index: {}]   ;;  %s1158_s4 = inlined_call_operand.vmem [shape: f32[1,32], index: 4, kind: input, shape index: {}]   ;;  %s1159_s5 = inlined_call_operand.hbm [shape: f32[32,64], index: 5, kind: input, shape index: {}]   ;;  %s1160_s6 = inlined_call_operand.vmem [shape: f32[1,64], index: 6, kind: input, shape index: {}]   ;;  %s1161_s7 = inlined_call_operand.hbm [shape: f32[16,64], index: 7, kind: output, shape index: {}]  }
   0x1   :  { %1162 = sst [smem:[#allocation13_spill]] %s1155_s1 }
   0x2   :  { %12 = vsyncpa [#allocation4], 0 }
   0x3   :  { %14 = vsyncpa [#allocation4 + $0x1], 0 }
   0x4   :  { %15 = vsyncpa [#allocation7], 0 }
   0x5   :  { %16 = vsyncpa [#allocation5], 0 }
   0x6   :  { %18 = vsyncpa [#allocation5 + $0x1], 0  ;;  %s989_s24 = smov 0   ;;  %s991_s25 = smov 0  }
   0x7   :  { %s993_s26 = smov 0   ;;  %s995_s27 = smov 0  }
   0x8   :  { %s997_s28 = smov 0   ;;  %s999_s29 = smov 0  }
   0x9 LB: > { %s649_s30 = sadd.s32 4294967295, %s942_s29   ;;  %p651_p0 = scmp.ge.s32.totalorder %s942_s29, 1  ;;  %s942_s29 = sphi %s999_s29, %s24_s29   ;;  %s938_s28 = sphi %s997_s28, %s1173_s28   ;;  %s934_s27 = sphi %s995_s27, %s1172_s27   ;;  %s930_s26 = sphi %s993_s26, %s1171_s26   ;;  %s926_s25 = sphi %s991_s25, %s1170_s25   ;;  %s922_s24 = sphi %s989_s24, %s1169_s24  }
   0xa   : > { %p1023_p1 = scmp.eq.s32.totalorder %s649_s30, 0  ;;  %p231_p2 = scmp.lt.s32.totalorder %s942_s29, 3 }
   0xb   : > { %s1164_s1 = sld [smem:[#allocation13_spill]]  ;;  %s944_s13 = smov [#allocation6]  }
   0xc   : > { %p1031_p3 = pnand %p651_p0, %p231_p2  ;;  %s244_s14 = sshll.u32 %s944_s13, 4  ;;  %s245_s14 = int_to_ptr.vmem [resolvable:$true] %s244_s14 }
   0xd   : > { %p655_p6 = scmp.ge.s32.totalorder %s942_s29, 2  ;;  %s267_s17 = sshll.u32 %s1159_s5, 4  ;;  %s268_s17 = int_to_ptr.hbm [resolvable:$true] %s267_s17 }
   0xe   : > { %p682_p4 = pneg %p1031_p3  ;;  %s945_s18 = smov 128  }
   0xf   : > { %s946_s19 = smov 8   ;;  %s947_s20 = smov [#allocation8]  }
  0x10   : > { %p683_p5 = pnand %p682_p4, %p1023_p1  ;;  %s269_s21 = sshll.u32 %s947_s20, 4  ;;  %s270_s21 = int_to_ptr.vmem [resolvable:$true] %s269_s21 }
  0x11   : > { %s242_s11 = sshll.u32 %s1164_s1, 4  ;;  %s36_s22 = sadd.s32 1, %s938_s28  ;;  %s243_s11 = int_to_ptr.hbm [resolvable:$true] %s242_s11 }
  0x12   : > { %685 = dma.hbm_to_vmem [thread:$0]  (!%p683_p5), %s243_s11, 512, %s245_s14, [#allocation7], %s945_s18, %s945_s18, %s946_s19  }
  0x13   : > { %688 = dma.hbm_to_vmem [thread:$0]  (!%p683_p5), %s268_s17, 512, %s270_s21, [#allocation7], %s945_s18, %s945_s18, %s946_s19  }
  0x14   : > { %s650_s23 = sadd.s32 4294967294, %s942_s29   ;;  %p38_p7 = scmp.ge.s32.totalorder %s36_s22, 2 }
  0x15   : > { %s43_s9 = sadd.s32 1, %s930_s26  ;;  %p50_p8 = scmp.ne.s32.totalorder %s930_s26, %s926_s25 }
  0x16   : > { %s1175_s22 = smov (%p38_p7, %s36_s22), 0  ;;  %p51_p9 = scmp.eq.s32.totalorder %s942_s29, 0 }
  0x17   : > { %p56_p10 = scmp.ne.s32.totalorder %s926_s25, %s922_s24  ;;  %s40_s10 = ssub.s32 %s938_s28, %s1175_s22 }
  0x18   : > { %p218_p11 = scmp.eq.s32.totalorder %s649_s30, 1  ;;  %p41_p12 = scmp.eq.s32.totalorder %s40_s10, 0 }
  0x19   : > { %p1059_p13 = por %p1023_p1, %p56_p10  ;;  %p224_p2 = scmp.eq.s32.totalorder %s650_s23, 1 }
  0x1a   : > { %p1063_p0 = por %p218_p11, %p50_p8  ;;  %p52_p4 = por %p51_p9, %p50_p8 }
  0x1b   : > { %s1068_s14 = scalar_select %p41_p12, %s930_s26, %s43_s9  }
  0x1c   : > { %p1070_p5 = por %p224_p2, %p56_p10  ;;  %s289_s16 = sand.u32 1, %s930_s26  }
  0x1d   : > { %s657_s30 = sshll.u32 %s938_s28, 3  ;;  %p699_p7 = scmp.lt.s32.totalorder %s942_s29, 2 }
  0x1e   : > { %s656_s17 = sshll.u32 %s289_s16, 3  ;;  %s297_s20 = scalar_lea.hbm %s1154_s0, %s657_s30 }
  0x1f   : > { %s299_s21 = sshll.u32 %s297_s20, 4  ;;  %s293_s10 = scalar_lea.vmem [#allocation3], %s656_s17  ;;  %s300_s21 = int_to_ptr.hbm [resolvable:$true] %s299_s21 }
  0x20   : > { %s301_s1 = sshll.u32 %s293_s10, 4  ;;  %p690_p11 = pnand %p699_p7, %p52_p4  ;;  %s302_s1 = int_to_ptr.vmem [resolvable:$true] %s301_s1 }
  0x21   : > { %s290_s23 = scalar_lea.sflag [#allocation4], %s289_s16  ;;  %310 = sbr.rel (%p1031_p3) target bundleno = 635 (0x27b), region = 48 }
  0x22   : > { %692 = dma.hbm_to_vmem [thread:$0]  (!%p690_p11), %s300_s21, 128, %s302_s1, %s290_s23  }
  0x23   : > { %s1083_s9 = sand.u32 (!%p1031_p3), 1, %s926_s25  }
  0x24   : > { %s659_s18 = sshll.u32 (!%p1031_p3), %s1083_s9, 3  ;;  %s313_s30 = scalar_lea.sflag (!%p1031_p3), [#allocation4], %s1083_s9 }
  0x25   : > { %s316_s17 = scalar_lea.vmem (!%p1031_p3), [#allocation3], %s659_s18 }
  0x26   : > { %909 = dma.done.wait (%p1059_p13), %s313_s30, 128  }
  0x27   : > { %911 = vsyncadd (%p1059_p13), %s313_s30, 4294967168 }
  0x28   : > { %913 = dma.done.wait (%p1023_p1), [#allocation7], 1024  }
  0x29   : > { %915 = vsyncadd (%p1023_p1), [#allocation7], 4294966272  ;;  %v371_v0 = vld [vmem:[#allocation6 + $0x18] sm:$0xff]  ;;  %v370_v1 = vld [vmem:[#allocation6 + $0x10] sm:$0xff]  ;;  %vm377_vm0 = vcmask 261120   ;;  %v948_v48 = vmov 32.0  }
  0x2a   : > { %393 = vmatpush.msra.mxu0 %v371_v0  ;;  %v369_v2 = vld [vmem:[#allocation6 + $0x8] sm:$0xff]  ;;  %v368_v3 = vld [vmem:[#allocation6] sm:$0xff]  ;;  %v372_v4 = vld [vmem:[%s316_s17] sm:$0xff]  ;;  %s667_s20 = sshll.u32 %s934_s27, 3  ;;  %s360_s1 = scalar_lea.vmem [#allocation9], %s659_s18  ;;  %vm518_vm9 = vcmask 523264  }
  0x2b   : > { %v756_v5 = vld [vmem:[%s1156_s2] ss:$0 sm:$0xff]  ;;  %v489_v60 = vld [vmem:[#allocation8 + $0x18] sm:$0xff]  ;;  %v488_v61 = vld [vmem:[#allocation8 + $0x10] sm:$0xff]  ;;  %s532_s23 = scalar_lea.hbm %s1161_s7, %s667_s20  ;;  %s534_s12 = sshll.u32 %s360_s1, 4  ;;  %s535_s12 = int_to_ptr.vmem [resolvable:$true] %s534_s12 }
  0x2c   : > { %394 = vmatpush.msra.mxu0 %v370_v1  ;;  %510 = vmatpush.msra.mxu1 %v489_v60  ;;  %v487_v62 = vld [vmem:[#allocation8 + $0x8] sm:$0xff]  ;;  %v486_v1 = vld [vmem:[#allocation8] sm:$0xff]  ;;  %s536_s8 = sshll.u32 %s532_s23, 4  ;;  %s521_s27 = scalar_lea.sflag [#allocation5], %s1083_s9  ;;  %s537_s8 = int_to_ptr.hbm [resolvable:$true] %s536_s8 }
  0x2d   : > { %s870_s11 = sshra.s32 %s537_s8, 4  ;;  %s876_s18 = scalar_lea.hbm %s1161_s7, 16  ;;  %s871_s11 = int_to_ptr.hbm [resolvable:$true] %s870_s11 }
  0x2e   : > { %395 = vmatpush.msra.mxu0 %v369_v2  ;;  %511 = vmatpush.msra.mxu1 %v488_v61  ;;  %s872_s16 = scalar_lea.hbm %s871_s11, 8  ;;  %p877_p9 = scmp.lt.s32.totalorder %s871_s11, %s1161_s7 }
  0x2f   : > { %p873_p1 = scmp.ne.s32.totalorder %s871_s11, %s872_s16  ;;  %p878_p10 = scmp.lt.s32.totalorder %s876_s18, %s872_s16 }
  0x30   : > { %396 = vmatpush.msra.mxu0 %v368_v3  ;;  %512 = vmatpush.msra.mxu1 %v487_v62 }
  0x31   : > { %663 = vmatmul.msk.f32.vlgmr.msra.gmra.mxu0 %vm377_vm0, %v372_v4  ;;  %p874_p3 = pnand %p873_p1, %p1063_p0  ;;  %p879_p12 = por %p878_p10, %p877_p9 }
  0x32   : > { %513 = vmatpush.msra.mxu1 %v486_v1 }
  0x33   : > { %p875_p8 = pneg %p874_p3 }
  0x35   : > { %p880_p13 = pnand %p879_p12, %p875_p8 }
  0xae   : > { %v398_v6 = vpop.f32.mrf.mxu0 }
  0xaf   : > { %v399_v7 = vadd.f32 %v756_v5, %v398_v6 }
  0xb1   : > { %v402_v8 = vmul.f32 0.70710677, %v399_v7  ;;  %v401_v44 = vmul.f32 0.5, %v399_v7 }
  0xb3   : > { %v403_v9 = vmul.f32 %v402_v8, %v402_v8 }
  0xb5   : > { %v404_v10 = vmin.f32 %v403_v9, 16.0  ;;  %v757_v9 = vld [vmem:[%s1157_s3] ss:$0 sm:$0xff] }
  0xb7   : > { %v405_v11 = vmul.f32 2.1237322e-06, %v404_v10  ;;  %v416_v12 = vmul.f32 3.8918573e-05, %v404_v10 }
  0xb9   : > { %v406_v13 = vadd.f32 0.00028619796, %v405_v11  ;;  %v417_v14 = vadd.f32 0.001143296, %v416_v12  ;;  %v758_v11 = vld [vmem:[%s1158_s4] ss:$0 sm:$0xff] }
  0xbb   : > { %v407_v15 = vmul.f32 %v406_v13, %v404_v10  ;;  %v418_v16 = vmul.f32 %v417_v14, %v404_v10 }
  0xbd   : > { %v419_v17 = vadd.f32 0.014752088, %v418_v16  ;;  %v408_v18 = vadd.f32 0.0036580483, %v407_v15  ;;  %v759_v16 = vld [vmem:[%s1160_s6] ss:$0 sm:$0xff] }
  0xbf   : > { %v420_v19 = vmul.f32 %v419_v17, %v404_v10  ;;  %v409_v21 = vmul.f32 %v408_v18, %v404_v10 }
  0xc1   : > { %v421_v20 = vadd.f32 0.112945676, %v420_v19  ;;  %v410_v24 = vadd.f32 0.05243302, %v409_v21 }
  0xc3   : > { %v422_v22 = vmul.f32 %v421_v20, %v404_v10  ;;  %v411_v27 = vmul.f32 %v410_v24, %v404_v10 }
  0xc5   : > { %v423_v23 = vadd.f32 0.4994258, %v422_v22  ;;  %v412_v28 = vadd.f32 0.18741608, %v411_v27 }
  0xc7   : > { %v424_v25 = vmul.f32 %v423_v23, %v404_v10  ;;  %v413_v30 = vmul.f32 %v412_v28, %v404_v10 }
  0xc9   : > { %v425_v26 = vadd.f32 1.0, %v424_v25  ;;  %v414_v34 = vadd.f32 1.1283791, %v413_v30 }
  0xcb   : > { %760 = vrcp.f32 %v425_v26  ;;  %v437_v33 = vand.u32 2147483648, %v425_v26  ;;  %v435_v36 = vand.u32 2147483647, %v425_v26  ;;  %vm431_vm2 = vweird.f32 %v425_v26 }
  0xcc   : > { %v415_v39 = vmul.f32 %v414_v34, %v402_v8  ;;  %762 = vrcp.f32 %v948_v48 }
  0xcd   : > { %v438_v38 = vor.u32 1.1754944e-38, %v437_v33  ;;  %vm436_vm4 = vcmp.eq.f32.partialorder %v435_v36, 8.507059e+37 }
  0xd1   : > { %v761_v29 = vpop.eup %760 }
  0xd2   : > { %v427_v31 = vmul.f32 %v761_v29, %v425_v26  ;;  %vm432_vm1 = vweird.f32 %v761_v29  ;;  %v763_v49 = vpop.eup %762 }
  0xd3   : > { %vm433_vm3 = vmor %vm431_vm2, %vm432_vm1  ;;  %v449_v50 = vmul.f32 32.0, %v763_v49  ;;  %vm453_vm5 = vweird.f32 %v763_v49 }
  0xd4   : > { %v428_v32 = vsub.f32 1.0, %v427_v31 }
  0xd5   : > { %v450_v51 = vsub.f32 1.0, %v449_v50 }
  0xd6   : > { %v429_v35 = vmul.f32 %v761_v29, %v428_v32 }
  0xd7   : > { %v451_v52 = vmul.f32 %v763_v49, %v450_v51 }
  0xd8   : > { %v430_v37 = vadd.f32 %v761_v29, %v429_v35 }
  0xd9   : > { %v452_v53 = vadd.f32 %v763_v49, %v451_v52 }
  0xda   : > { %v434_v40 = vsel %vm433_vm3, %v761_v29, %v430_v37 }
  0xdb   : > { %v439_v41 = vsel %vm436_vm4, %v438_v38, %v434_v40  ;;  %v454_v54 = vsel %vm453_vm5, %v763_v49, %v452_v53 }
  0xdc   : > { %v440_v42 = vmul.f32 %v439_v41, %v415_v39 }
  0xde   : > { %v664_v43 = vclamps-f32 %v440_v42, 1.0 }
  0xe0   : > { %v443_v45 = vadd.f32 1.0, %v664_v43 }
  0xe2   : > { %v444_v46 = vmul.f32 %v443_v45, %v401_v44 }
  0xe4   : > { %v445_v47 = vsel %vm377_vm0, %v444_v46, 0.0 }
  0xe5   : > { %446 = vadd.xlane.f32.xlu0 %v445_v47 }
 0x158   : > { %v447_v55 = vpop.xlane.xlu0 %446 }
 0x159   : > { %v455_v56 = vmul.f32 %v454_v54, %v447_v55 }
 0x15b   : > { %v456_v57 = vsub.f32 %v444_v46, %v455_v56 }
 0x15d   : > { %v457_v58 = vmul.f32 %v456_v57, %v456_v57 }
 0x15f   : > { %v458_v59 = vsel %vm377_vm0, %v457_v58, 0.0 }
 0x160   : > { %459 = vadd.xlane.f32.xlu0 %v458_v59 }
 0x1d3   : > { %v460_v63 = vpop.xlane.xlu0 %459 }
 0x1d4   : > { %v461_v0 = vmul.f32 %v460_v63, %v454_v54 }
 0x1d6   : > { %v462_v2 = vadd.f32 1e-05, %v461_v0 }
 0x1d8   : > { %764 = vrsqrt.f32 %v462_v2  ;;  %vm469_vm7 = vweird.f32 %v462_v2 }
 0x1de   : > { %v765_v3 = vpop.eup %764 }
 0x1df   : > { %v464_v4 = vmul.f32 %v765_v3, %v462_v2  ;;  %vm470_vm6 = vweird.f32 %v765_v3 }
 0x1e0   : > { %vm471_vm8 = vmor %vm469_vm7, %vm470_vm6 }
 0x1e1   : > { %v465_v5 = vmul.f32 %v765_v3, %v464_v4 }
 0x1e3   : > { %v466_v6 = vmul.f32 0.5, %v465_v5 }
 0x1e5   : > { %v467_v7 = vsub.f32 1.5, %v466_v6 }
 0x1e7   : > { %v468_v8 = vmul.f32 %v765_v3, %v467_v7 }
 0x1e9   : > { %v472_v10 = vsel %vm471_vm8, %v765_v3, %v468_v8 }
 0x1ea   : > { %v473_v12 = vmul.f32 %v472_v10, %v456_v57 }
 0x1ec   : > { %v478_v13 = vmul.f32 %v757_v9, %v473_v12 }
 0x1ee   : > { %v483_v14 = vadd.f32 %v758_v11, %v478_v13 }
 0x1f0   : > { %484 = vst.msk [vmem:[#allocation2] sm:$0xff] %vm377_vm0, %v483_v14 }
 0x1f7   : > { %v485_v15 = vld [vmem:[#allocation2] sm:$0xff] }
 0x1f8   : > { %665 = vmatmul.msk.f32.vlgmr.msra.gmra.mxu1 %vm377_vm0, %v485_v15 }
 0x275   : > { %v515_v17 = vpop.f32.mrf.mxu1 }
 0x276   : > { %v516_v18 = vadd.f32 %v759_v16, %v515_v17 }
 0x278   : > { %519 = vst.msk [vmem:[%s360_s1] sm:$0xff] %vm518_vm9, %v516_v18 }
 0x279   : > { %883 = shalt.err (!%p880_p13)
}
 0x27a   : > { %680 = dma.vmem_to_hbm [thread:$0]  (%p1063_p0), %s535_s12, 128, %s537_s8, %s521_s27  }
 0x27b PF: > { %s548_s9 = sand.u32 1, %s922_s24   ;;  %p694_p2 = pnand %p655_p6, %p1070_p5 }
 0x27c   : > { %s549_s23 = scalar_lea.sflag [#allocation5], %s548_s9 }
 0x27d   : > { %p695_p4 = pneg %p694_p2 }
 0x27f   : > { %917 = dma.done.wait (%p695_p4), %s549_s23, 128  }
 0x280   : > { %919 = vsyncadd (%p695_p4), %s549_s23, 4294967168  ;;  %s24_s29 = sadd.s32 1, %s942_s29   ;;  %s1169_s24 = smov %s926_s25 }
 0x281   : > { %p21_p7 = scmp.ge.s32.totalorder %s24_s29, 4   ;;  %s1170_s25 = smov %s930_s26 }
 0x282   : > { %s1171_s26 = smov %s1068_s14  ;;  %s1172_s27 = smov %s938_s28 }
 0x283   : > { %s1173_s28 = smov %s1175_s22  ;;  %23 = sbr.rel (!%p21_p7) target bundleno = 9 (0x9), region = 109 }
 0x288   :  { %555 = vsyncpa [#allocation4], 1 }
 0x289   :  { %557 = vsyncpa [#allocation4 + $0x1], 1 }
 0x28a   :  { %558 = vsyncpa [#allocation7], 1 }
 0x28b   :  { %559 = vsyncpa [#allocation5], 1 }
 0x28c   :  { %561 = vsyncpa [#allocation5 + $0x1], 1 }

// kernel: tpu_custom_call.1
= control target key start
LH: loop header
LB: loop body
LE: loop exit
PB: predicated region body
PF: predicated region fallthrough
CT: control target
= control target key end

     0   :  { %s1154_s0 = inlined_call_operand.hbm [shape: f32[16,32], index: 0, kind: input, shape index: {}]   ;;  %s1155_s1 = inlined_call_operand.hbm [shape: f32[32,32], index: 1, kind: input, shape index: {}]   ;;  %s1156_s2 = inlined_call_operand.vmem [shape: f32[1,32], index: 2, kind: input, shape index: {}]   ;;  %s1157_s3 = inlined_call_operand.vmem [shape: f32[1,32], index: 3, kind: input, shape index: {}]   ;;  %s1158_s4 = inlined_call_operand.vmem [shape: f32[1,32], index: 4, kind: input, shape index: {}]   ;;  %s1159_s5 = inlined_call_operand.hbm [shape: f32[32,64], index: 5, kind: input, shape index: {}]   ;;  %s1160_s6 = inlined_call_operand.vmem [shape: f32[1,64], index: 6, kind: input, shape index: {}]   ;;  %s1161_s7 = inlined_call_operand.hbm [shape: f32[16,64], index: 7, kind: output, shape index: {}]  }
   0x1   :  { %1162 = sst [smem:[#allocation13_spill]] %s1155_s1 }
   0x2   :  { %12 = vsyncpa [#allocation4], 0 }
   0x3   :  { %14 = vsyncpa [#allocation4 + $0x1], 0 }
   0x4   :  { %15 = vsyncpa [#allocation7], 0 }
   0x5   :  { %16 = vsyncpa [#allocation5], 0 }
   0x6   :  { %18 = vsyncpa [#allocation5 + $0x1], 0  ;;  %s989_s24 = smov 0   ;;  %s991_s25 = smov 0  }
   0x7   :  { %s993_s26 = smov 0   ;;  %s995_s27 = smov 0  }
   0x8   :  { %s997_s28 = smov 0   ;;  %s999_s29 = smov 0  }
   0x9 LB: > { %s649_s30 = sadd.s32 4294967295, %s942_s29   ;;  %p651_p0 = scmp.ge.s32.totalorder %s942_s29, 1  ;;  %s942_s29 = sphi %s999_s29, %s24_s29   ;;  %s938_s28 = sphi %s997_s28, %s1173_s28   ;;  %s934_s27 = sphi %s995_s27, %s1172_s27   ;;  %s930_s26 = sphi %s993_s26, %s1171_s26   ;;  %s926_s25 = sphi %s991_s25, %s1170_s25   ;;  %s922_s24 = sphi %s989_s24, %s1169_s24  }
   0xa   : > { %p1023_p1 = scmp.eq.s32.totalorder %s649_s30, 0  ;;  %p231_p2 = scmp.lt.s32.totalorder %s942_s29, 3 }
   0xb   : > { %s1164_s1 = sld [smem:[#allocation13_spill]]  ;;  %s944_s13 = smov [#allocation6]  }
   0xc   : > { %p1031_p3 = pnand %p651_p0, %p231_p2  ;;  %s244_s14 = sshll.u32 %s944_s13, 4  ;;  %s245_s14 = int_to_ptr.vmem [resolvable:$true] %s244_s14 }
   0xd   : > { %p655_p6 = scmp.ge.s32.totalorder %s942_s29, 2  ;;  %s267_s17 = sshll.u32 %s1159_s5, 4  ;;  %s268_s17 = int_to_ptr.hbm [resolvable:$true] %s267_s17 }
   0xe   : > { %p682_p4 = pneg %p1031_p3  ;;  %s945_s18 = smov 128  }
   0xf   : > { %s946_s19 = smov 8   ;;  %s947_s20 = smov [#allocation8]  }
  0x10   : > { %p683_p5 = pnand %p682_p4, %p1023_p1  ;;  %s269_s21 = sshll.u32 %s947_s20, 4  ;;  %s270_s21 = int_to_ptr.vmem [resolvable:$true] %s269_s21 }
  0x11   : > { %s242_s11 = sshll.u32 %s1164_s1, 4  ;;  %s36_s22 = sadd.s32 1, %s938_s28  ;;  %s243_s11 = int_to_ptr.hbm [resolvable:$true] %s242_s11 }
  0x12   : > { %685 = dma.hbm_to_vmem [thread:$0]  (!%p683_p5), %s243_s11, 512, %s245_s14, [#allocation7], %s945_s18, %s945_s18, %s946_s19  }
  0x13   : > { %688 = dma.hbm_to_vmem [thread:$0]  (!%p683_p5), %s268_s17, 512, %s270_s21, [#allocation7], %s945_s18, %s945_s18, %s946_s19  }
  0x14   : > { %s650_s23 = sadd.s32 4294967294, %s942_s29   ;;  %p38_p7 = scmp.ge.s32.totalorder %s36_s22, 2 }
  0x15   : > { %s43_s9 = sadd.s32 1, %s930_s26  ;;  %p50_p8 = scmp.ne.s32.totalorder %s930_s26, %s926_s25 }
  0x16   : > { %s1175_s22 = smov (%p38_p7, %s36_s22), 0  ;;  %p51_p9 = scmp.eq.s32.totalorder %s942_s29, 0 }
  0x17   : > { %p56_p10 = scmp.ne.s32.totalorder %s926_s25, %s922_s24  ;;  %s40_s10 = ssub.s32 %s938_s28, %s1175_s22 }
  0x18   : > { %p218_p11 = scmp.eq.s32.totalorder %s649_s30, 1  ;;  %p41_p12 = scmp.eq.s32.totalorder %s40_s10, 0 }
  0x19   : > { %p1059_p13 = por %p1023_p1, %p56_p10  ;;  %p224_p2 = scmp.eq.s32.totalorder %s650_s23, 1 }
  0x1a   : > { %p1063_p0 = por %p218_p11, %p50_p8  ;;  %p52_p4 = por %p51_p9, %p50_p8 }
  0x1b   : > { %s1068_s14 = scalar_select %p41_p12, %s930_s26, %s43_s9  }
  0x1c   : > { %p1070_p5 = por %p224_p2, %p56_p10  ;;  %s289_s16 = sand.u32 1, %s930_s26  }
  0x1d   : > { %s657_s30 = sshll.u32 %s938_s28, 3  ;;  %p699_p7 = scmp.lt.s32.totalorder %s942_s29, 2 }
  0x1e   : > { %s656_s17 = sshll.u32 %s289_s16, 3  ;;  %s297_s20 = scalar_lea.hbm %s1154_s0, %s657_s30 }
  0x1f   : > { %s299_s21 = sshll.u32 %s297_s20, 4  ;;  %s293_s10 = scalar_lea.vmem [#allocation3], %s656_s17  ;;  %s300_s21 = int_to_ptr.hbm [resolvable:$true] %s299_s21 }
  0x20   : > { %s301_s1 = sshll.u32 %s293_s10, 4  ;;  %p690_p11 = pnand %p699_p7, %p52_p4  ;;  %s302_s1 = int_to_ptr.vmem [resolvable:$true] %s301_s1 }
  0x21   : > { %s290_s23 = scalar_lea.sflag [#allocation4], %s289_s16  ;;  %310 = sbr.rel (%p1031_p3) target bundleno = 635 (0x27b), region = 48 }
  0x22   : > { %692 = dma.hbm_to_vmem [thread:$0]  (!%p690_p11), %s300_s21, 128, %s302_s1, %s290_s23  }
  0x23   : > { %s1083_s9 = sand.u32 (!%p1031_p3), 1, %s926_s25  }
  0x24   : > { %s659_s18 = sshll.u32 (!%p1031_p3), %s1083_s9, 3  ;;  %s313_s30 = scalar_lea.sflag (!%p1031_p3), [#allocation4], %s1083_s9 }
  0x25   : > { %s316_s17 = scalar_lea.vmem (!%p1031_p3), [#allocation3], %s659_s18 }
  0x26   : > { %909 = dma.done.wait (%p1059_p13), %s313_s30, 128  }
  0x27   : > { %911 = vsyncadd (%p1059_p13), %s313_s30, 4294967168 }
  0x28   : > { %913 = dma.done.wait (%p1023_p1), [#allocation7], 1024  }
  0x29   : > { %915 = vsyncadd (%p1023_p1), [#allocation7], 4294966272  ;;  %v371_v0 = vld [vmem:[#allocation6 + $0x18] sm:$0xff]  ;;  %v370_v1 = vld [vmem:[#allocation6 + $0x10] sm:$0xff]  ;;  %vm377_vm0 = vcmask 261120   ;;  %v948_v48 = vmov 32.0  }
  0x2a   : > { %393 = vmatpush.msra.mxu0 %v371_v0  ;;  %v369_v2 = vld [vmem:[#allocation6 + $0x8] sm:$0xff]  ;;  %v368_v3 = vld [vmem:[#allocation6] sm:$0xff]  ;;  %v372_v4 = vld [vmem:[%s316_s17] sm:$0xff]  ;;  %s667_s20 = sshll.u32 %s934_s27, 3  ;;  %s360_s1 = scalar_lea.vmem [#allocation9], %s659_s18  ;;  %vm518_vm9 = vcmask 523264  }
  0x2b   : > { %v756_v5 = vld [vmem:[%s1156_s2] ss:$0 sm:$0xff]  ;;  %v489_v60 = vld [vmem:[#allocation8 + $0x18] sm:$0xff]  ;;  %v488_v61 = vld [vmem:[#allocation8 + $0x10] sm:$0xff]  ;;  %s532_s23 = scalar_lea.hbm %s1161_s7, %s667_s20  ;;  %s534_s12 = sshll.u32 %s360_s1, 4  ;;  %s535_s12 = int_to_ptr.vmem [resolvable:$true] %s534_s12 }
  0x2c   : > { %394 = vmatpush.msra.mxu0 %v370_v1  ;;  %510 = vmatpush.msra.mxu1 %v489_v60  ;;  %v487_v62 = vld [vmem:[#allocation8 + $0x8] sm:$0xff]  ;;  %v486_v1 = vld [vmem:[#allocation8] sm:$0xff]  ;;  %s536_s8 = sshll.u32 %s532_s23, 4  ;;  %s521_s27 = scalar_lea.sflag [#allocation5], %s1083_s9  ;;  %s537_s8 = int_to_ptr.hbm [resolvable:$true] %s536_s8 }
  0x2d   : > { %s870_s11 = sshra.s32 %s537_s8, 4  ;;  %s876_s18 = scalar_lea.hbm %s1161_s7, 16  ;;  %s871_s11 = int_to_ptr.hbm [resolvable:$true] %s870_s11 }
  0x2e   : > { %395 = vmatpush.msra.mxu0 %v369_v2  ;;  %511 = vmatpush.msra.mxu1 %v488_v61  ;;  %s872_s16 = scalar_lea.hbm %s871_s11, 8  ;;  %p877_p9 = scmp.lt.s32.totalorder %s871_s11, %s1161_s7 }
  0x2f   : > { %p873_p1 = scmp.ne.s32.totalorder %s871_s11, %s872_s16  ;;  %p878_p10 = scmp.lt.s32.totalorder %s876_s18, %s872_s16 }
  0x30   : > { %396 = vmatpush.msra.mxu0 %v368_v3  ;;  %512 = vmatpush.msra.mxu1 %v487_v62 }
  0x31   : > { %663 = vmatmul.msk.f32.vlgmr.msra.gmra.mxu0 %vm377_vm0, %v372_v4  ;;  %p874_p3 = pnand %p873_p1, %p1063_p0  ;;  %p879_p12 = por %p878_p10, %p877_p9 }
  0x32   : > { %513 = vmatpush.msra.mxu1 %v486_v1 }
  0x33   : > { %p875_p8 = pneg %p874_p3 }
  0x35   : > { %p880_p13 = pnand %p879_p12, %p875_p8 }
  0xae   : > { %v398_v6 = vpop.f32.mrf.mxu0 }
  0xaf   : > { %v399_v7 = vadd.f32 %v756_v5, %v398_v6 }
  0xb1   : > { %v402_v8 = vmul.f32 0.70710677, %v399_v7  ;;  %v401_v44 = vmul.f32 0.5, %v399_v7 }
  0xb3   : > { %v403_v9 = vmul.f32 %v402_v8, %v402_v8 }
  0xb5   : > { %v404_v10 = vmin.f32 %v403_v9, 16.0  ;;  %v757_v9 = vld [vmem:[%s1157_s3] ss:$0 sm:$0xff] }
  0xb7   : > { %v405_v11 = vmul.f32 2.1237322e-06, %v404_v10  ;;  %v416_v12 = vmul.f32 3.8918573e-05, %v404_v10 }
  0xb9   : > { %v406_v13 = vadd.f32 0.00028619796, %v405_v11  ;;  %v417_v14 = vadd.f32 0.001143296, %v416_v12  ;;  %v758_v11 = vld [vmem:[%s1158_s4] ss:$0 sm:$0xff] }
  0xbb   : > { %v407_v15 = vmul.f32 %v406_v13, %v404_v10  ;;  %v418_v16 = vmul.f32 %v417_v14, %v404_v10 }
  0xbd   : > { %v419_v17 = vadd.f32 0.014752088, %v418_v16  ;;  %v408_v18 = vadd.f32 0.0036580483, %v407_v15  ;;  %v759_v16 = vld [vmem:[%s1160_s6] ss:$0 sm:$0xff] }
  0xbf   : > { %v420_v19 = vmul.f32 %v419_v17, %v404_v10  ;;  %v409_v21 = vmul.f32 %v408_v18, %v404_v10 }
  0xc1   : > { %v421_v20 = vadd.f32 0.112945676, %v420_v19  ;;  %v410_v24 = vadd.f32 0.05243302, %v409_v21 }
  0xc3   : > { %v422_v22 = vmul.f32 %v421_v20, %v404_v10  ;;  %v411_v27 = vmul.f32 %v410_v24, %v404_v10 }
  0xc5   : > { %v423_v23 = vadd.f32 0.4994258, %v422_v22  ;;  %v412_v28 = vadd.f32 0.18741608, %v411_v27 }
  0xc7   : > { %v424_v25 = vmul.f32 %v423_v23, %v404_v10  ;;  %v413_v30 = vmul.f32 %v412_v28, %v404_v10 }
  0xc9   : > { %v425_v26 = vadd.f32 1.0, %v424_v25  ;;  %v414_v34 = vadd.f32 1.1283791, %v413_v30 }
  0xcb   : > { %760 = vrcp.f32 %v425_v26  ;;  %v437_v33 = vand.u32 2147483648, %v425_v26  ;;  %v435_v36 = vand.u32 2147483647, %v425_v26  ;;  %vm431_vm2 = vweird.f32 %v425_v26 }
  0xcc   : > { %v415_v39 = vmul.f32 %v414_v34, %v402_v8  ;;  %762 = vrcp.f32 %v948_v48 }
  0xcd   : > { %v438_v38 = vor.u32 1.1754944e-38, %v437_v33  ;;  %vm436_vm4 = vcmp.eq.f32.partialorder %v435_v36, 8.507059e+37 }
  0xd1   : > { %v761_v29 = vpop.eup %760 }
  0xd2   : > { %v427_v31 = vmul.f32 %v761_v29, %v425_v26  ;;  %vm432_vm1 = vweird.f32 %v761_v29  ;;  %v763_v49 = vpop.eup %762 }
  0xd3   : > { %vm433_vm3 = vmor %vm431_vm2, %vm432_vm1  ;;  %v449_v50 = vmul.f32 32.0, %v763_v49  ;;  %vm453_vm5 = vweird.f32 %v763_v49 }
  0xd4   : > { %v428_v32 = vsub.f32 1.0, %v427_v31 }
  0xd5   : > { %v450_v51 = vsub.f32 1.0, %v449_v50 }
  0xd6   : > { %v429_v35 = vmul.f32 %v761_v29, %v428_v32 }
  0xd7   : > { %v451_v52 = vmul.f32 %v763_v49, %v450_v51 }
  0xd8   : > { %v430_v37 = vadd.f32 %v761_v29, %v429_v35 }
  0xd9   : > { %v452_v53 = vadd.f32 %v763_v49, %v451_v52 }
  0xda   : > { %v434_v40 = vsel %vm433_vm3, %v761_v29, %v430_v37 }
  0xdb   : > { %v439_v41 = vsel %vm436_vm4, %v438_v38, %v434_v40  ;;  %v454_v54 = vsel %vm453_vm5, %v763_v49, %v452_v53 }
  0xdc   : > { %v440_v42 = vmul.f32 %v439_v41, %v415_v39 }
  0xde   : > { %v664_v43 = vclamps-f32 %v440_v42, 1.0 }
  0xe0   : > { %v443_v45 = vadd.f32 1.0, %v664_v43 }
  0xe2   : > { %v444_v46 = vmul.f32 %v443_v45, %v401_v44 }
  0xe4   : > { %v445_v47 = vsel %vm377_vm0, %v444_v46, 0.0 }
  0xe5   : > { %446 = vadd.xlane.f32.xlu0 %v445_v47 }
 0x158   : > { %v447_v55 = vpop.xlane.xlu0 %446 }
 0x159   : > { %v455_v56 = vmul.f32 %v454_v54, %v447_v55 }
 0x15b   : > { %v456_v57 = vsub.f32 %v444_v46, %v455_v56 }
 0x15d   : > { %v457_v58 = vmul.f32 %v456_v57, %v456_v57 }
 0x15f   : > { %v458_v59 = vsel %vm377_vm0, %v457_v58, 0.0 }
 0x160   : > { %459 = vadd.xlane.f32.xlu0 %v458_v59 }
 0x1d3   : > { %v460_v63 = vpop.xlane.xlu0 %459 }
 0x1d4   : > { %v461_v0 = vmul.f32 %v460_v63, %v454_v54 }
 0x1d6   : > { %v462_v2 = vadd.f32 1e-05, %v461_v0 }
 0x1d8   : > { %764 = vrsqrt.f32 %v462_v2  ;;  %vm469_vm7 = vweird.f32 %v462_v2 }
 0x1de   : > { %v765_v3 = vpop.eup %764 }
 0x1df   : > { %v464_v4 = vmul.f32 %v765_v3, %v462_v2  ;;  %vm470_vm6 = vweird.f32 %v765_v3 }
 0x1e0   : > { %vm471_vm8 = vmor %vm469_vm7, %vm470_vm6 }
 0x1e1   : > { %v465_v5 = vmul.f32 %v765_v3, %v464_v4 }
 0x1e3   : > { %v466_v6 = vmul.f32 0.5, %v465_v5 }
 0x1e5   : > { %v467_v7 = vsub.f32 1.5, %v466_v6 }
 0x1e7   : > { %v468_v8 = vmul.f32 %v765_v3, %v467_v7 }
 0x1e9   : > { %v472_v10 = vsel %vm471_vm8, %v765_v3, %v468_v8 }
 0x1ea   : > { %v473_v12 = vmul.f32 %v472_v10, %v456_v57 }
 0x1ec   : > { %v478_v13 = vmul.f32 %v757_v9, %v473_v12 }
 0x1ee   : > { %v483_v14 = vadd.f32 %v758_v11, %v478_v13 }
 0x1f0   : > { %484 = vst.msk [vmem:[#allocation2] sm:$0xff] %vm377_vm0, %v483_v14 }
 0x1f7   : > { %v485_v15 = vld [vmem:[#allocation2] sm:$0xff] }
 0x1f8   : > { %665 = vmatmul.msk.f32.vlgmr.msra.gmra.mxu1 %vm377_vm0, %v485_v15 }
 0x275   : > { %v515_v17 = vpop.f32.mrf.mxu1 }
 0x276   : > { %v516_v18 = vadd.f32 %v759_v16, %v515_v17 }
 0x278   : > { %519 = vst.msk [vmem:[%s360_s1] sm:$0xff] %vm518_vm9, %v516_v18 }
 0x279   : > { %883 = shalt.err (!%p880_p13)
}
 0x27a   : > { %680 = dma.vmem_to_hbm [thread:$0]  (%p1063_p0), %s535_s12, 128, %s537_s8, %s521_s27  }
 0x27b PF: > { %s548_s9 = sand.u32 1, %s922_s24   ;;  %p694_p2 = pnand %p655_p6, %p1070_p5 }
 0x27c   : > { %s549_s23 = scalar_lea.sflag [#allocation5], %s548_s9 }
 0x27d   : > { %p695_p4 = pneg %p694_p2 }
 0x27f   : > { %917 = dma.done.wait (%p695_p4), %s549_s23, 128  }
 0x280   : > { %919 = vsyncadd (%p695_p4), %s549_s23, 4294967168  ;;  %s24_s29 = sadd.s32 1, %s942_s29   ;;  %s1169_s24 = smov %s926_s25 }
 0x281   : > { %p21_p7 = scmp.ge.s32.totalorder %s24_s29, 4   ;;  %s1170_s25 = smov %s930_s26 }
 0x282   : > { %s1171_s26 = smov %s1068_s14  ;;  %s1172_s27 = smov %s938_s28 }
 0x283   : > { %s1173_s28 = smov %s1175_s22  ;;  %23 = sbr.rel (!%p21_p7) target bundleno = 9 (0x9), region = 109 }
 0x288   :  { %555 = vsyncpa [#allocation4], 1 }
 0x289   :  { %557 = vsyncpa [#allocation4 + $0x1], 1 }
 0x28a   :  { %558 = vsyncpa [#allocation7], 1 }
 0x28b   :  { %559 = vsyncpa [#allocation5], 1 }
 0x28c   :  { %561 = vsyncpa [#allocation5 + $0x1], 1 }

</bundles_post_ra>
